<compile_context>
chip_gen: v7x
topology: tpu7x:2x2x1
jax: 0.10.0
libtpu: 0.0.40
codegen_flags: <defaults>
</compile_context>

<pallas_src>
import jax
import jax.numpy as jnp
from jax.experimental import pallas as pl
from jax.experimental.pallas import tpu as pltpu

_LANES = 128
_SUBLANES = 8


def _brl_kernel(n_ref, pred_ref, gt_ref, out_ref):
    # n_ref:    (1,)    int32 SMEM  -- T, the true (unpadded) number of frames.
    # pred_ref: (R,128) logits in VMEM, time laid out row-major (sublane-dense).
    # gt_ref:   (R,128) integer frame labels in VMEM, same layout.
    # out_ref:  (1,1)   float32 SMEM scalar loss.
    x = pred_ref[...].astype(jnp.float32)                    # (R, 128)
    gt = gt_ref[...]                                         # (R, 128) int

    # prev[r, l] = gt at flat time index r*128 + l - 1:
    #   lane roll (+1) handles l >= 1; for the row-crossing element at lane 0 we also
    #   roll by +1 along sublanes and select.  Both shifts are non-negative (XLU ops).
    lane_rolled = pltpu.roll(gt, shift=1, axis=1)            # gt[r, (l-1) % 128]
    row_rolled = pltpu.roll(lane_rolled, shift=1, axis=0)    # gt[(r-1) % R, (l-1) % 128]
    lane = jax.lax.broadcasted_iota(jnp.int32, gt.shape, dimension=1)
    prev = jnp.where(lane == 0, row_rolled, lane_rolled)

    # Boundary target: where(gt[t] - gt[t-1] != 0, 1, 0) == (gt[t] != gt[t-1]) for int labels.
    target = (gt != prev).astype(jnp.float32)

    # Numerically stable BCE-with-logits per element (PyTorch formulation).
    elem = jnp.maximum(x, 0.0) - x * target + jnp.log1p(jnp.exp(-jnp.abs(x)))

    # Only flat indices t in [1, T-1] contribute (there are T-1 boundaries).  Padding lanes
    # and the wrap-around element are removed with a select so garbage can never propagate.
    sub = jax.lax.broadcasted_iota(jnp.int32, gt.shape, dimension=0)
    t = sub * _LANES + lane
    n = n_ref[0]
    valid = jnp.logical_and(t >= 1, t < n)
    elem = jnp.where(valid, elem, 0.0)

    out_ref[0, 0] = jnp.sum(elem) / (n - 1).astype(jnp.float32)


def boundary_regression_loss(pred, gt, threshold: float = 4, ignore_index: int = -1):
    """Pallas implementation of BoundaryRegressionLoss.forward.

    pred: (T,) or (T, 1) logits (callers should prefer (T,) — a (T, 1) f32 array needs a
    relayout copy on TPU); gt: (T,) integer frame labels.
    threshold / ignore_index are unused in the reference forward (kept for parity).
    """
    T = gt.shape[0]
    assert T >= 2, "need at least two frames to form a boundary diff"
    assert jnp.issubdtype(gt.dtype, jnp.integer), (
        "gt must hold integer frame labels (matches where(d != 0, 1, d) semantics)")

    pred_flat = pred.reshape(T)   # native dtype; upcast to f32 happens in-kernel
    gt_flat = gt.reshape(T)       # native integer dtype through HBM/DMA

    # Bucket the time axis into sublane-dense (R, 128) tiles with R a multiple of 8:
    # one compiled kernel serves every T inside a 1024-frame bucket (T is a runtime SMEM
    # scalar), and every vector op works on full (8, 128) vregs.
    rows = max(_SUBLANES,
               ((pl.cdiv(T, _LANES) + _SUBLANES - 1) // _SUBLANES) * _SUBLANES)
    padded = rows * _LANES
    if padded != T:
        pred_flat = jnp.pad(pred_flat, (0, padded - T))
        gt_flat = jnp.pad(gt_flat, (0, padded - T))
    pred_tiles = pred_flat.reshape(rows, _LANES)
    gt_tiles = gt_flat.reshape(rows, _LANES)
    n = jnp.array([T], dtype=jnp.int32)

    out = pl.pallas_call(
        _brl_kernel,
        out_shape=jax.ShapeDtypeStruct((1, 1), jnp.float32),
        in_specs=[
            pl.BlockSpec(memory_space=pltpu.MemorySpace.SMEM),   # runtime length T
            pl.BlockSpec(memory_space=pltpu.MemorySpace.VMEM),   # pred tiles (R, 128)
            pl.BlockSpec(memory_space=pltpu.MemorySpace.VMEM),   # gt tiles   (R, 128)
        ],
        out_specs=pl.BlockSpec(memory_space=pltpu.MemorySpace.SMEM),
    )(n, pred_tiles, gt_tiles)
    return out[0, 0]


def _reference_loss(pred, gt):
    # pure-JAX reference for correctness check
    d = gt[1:].astype(jnp.float32) - gt[:-1].astype(jnp.float32)
    gt2 = jnp.where(d != 0.0, 1.0, d)[:, None]
    x = pred[1:].reshape(-1, 1).astype(jnp.float32)
    return jnp.mean(jnp.maximum(x, 0.0) - x * gt2 + jnp.log1p(jnp.exp(-jnp.abs(x))))


if __name__ == "__main__":
    key = jax.random.PRNGKey(0)

    # Test 1: short sequence (fits well inside one 1024-frame bucket).
    k1, k2 = jax.random.split(key)
    T = 100
    pred = jax.random.normal(k1, (T, 1), dtype=jnp.float32)
    gt = jax.random.randint(k2, (T,), minval=0, maxval=5, dtype=jnp.int32)
    loss = jax.block_until_ready(boundary_regression_loss(pred, gt))
    ref = _reference_loss(pred, gt)
    assert jnp.allclose(loss, ref, rtol=1e-5, atol=1e-6), (loss, ref)

    # Test 2: sequence spanning several 128-lane rows (exercises the row-crossing neighbor
    # at lane 0) but the same bucket shape -> reuses the compiled kernel.
    k3, k4 = jax.random.split(k1)
    T2 = 300
    pred2 = jax.random.normal(k3, (T2, 1), dtype=jnp.float32)
    gt2 = jax.random.randint(k4, (T2,), minval=0, maxval=5, dtype=jnp.int32)
    loss2 = jax.block_until_ready(boundary_regression_loss(pred2, gt2))
    ref2 = _reference_loss(pred2, gt2)
    assert jnp.allclose(loss2, ref2, rtol=1e-5, atol=1e-6), (loss2, ref2)

    print("KERNEL_OK")
</pallas_src>

<mosaic_0001>
module attributes {stable_mosaic.version = 11 : i64} {
  func.func @_brl_kernel(%arg0: memref<1xi32, #tpu.memory_space<smem>>, %arg1: memref<8x128xf32, #tpu.memory_space<vmem>>, %arg2: memref<8x128xi32, #tpu.memory_space<vmem>>, %arg3: memref<1x1xf32, #tpu.memory_space<smem>>) attributes {dimension_semantics = [], scalar_prefetch = 0 : i64, scratch_operands = 0 : i64, tpu.core_type = #tpu.core_type<tc>} {
    %c0 = arith.constant 0 : index
    %c0_0 = arith.constant 0 : index
    %0 = vector.load %arg1[%c0, %c0_0] : memref<8x128xf32, #tpu.memory_space<vmem>>, vector<8x128xf32>
    %c0_1 = arith.constant 0 : index
    %c0_2 = arith.constant 0 : index
    %1 = vector.load %arg2[%c0_1, %c0_2] : memref<8x128xi32, #tpu.memory_space<vmem>>, vector<8x128xi32>
    %c1_i32 = arith.constant 1 : i32
    %2 = tpu.dynamic_rotate %1 by %c1_i32 dim 1 : vector<8x128xi32>, i32 -> vector<8x128xi32>
    %c1_i32_3 = arith.constant 1 : i32
    %3 = tpu.dynamic_rotate %2 by %c1_i32_3 dim 0 : vector<8x128xi32>, i32 -> vector<8x128xi32>
    %4 = tpu.iota {dimensions = array<i32: 1>} : vector<8x128xi32>
    %c0_i32 = arith.constant 0 : i32
    %5 = vector.broadcast %c0_i32 : i32 to vector<8x128xi32>
    %6 = arith.cmpi eq, %4, %5 : vector<8x128xi32>
    %7 = arith.select %6, %3, %2 : vector<8x128xi1>, vector<8x128xi32>
    %8 = arith.cmpi ne, %1, %7 : vector<8x128xi32>
    %9 = arith.extui %8 : vector<8x128xi1> to vector<8x128xi32>
    %10 = arith.sitofp %9 : vector<8x128xi32> to vector<8x128xf32>
    %cst = arith.constant 0.000000e+00 : f32
    %11 = vector.broadcast %cst : f32 to vector<8x128xf32>
    %12 = arith.maximumf %0, %11 : vector<8x128xf32>
    %13 = arith.mulf %0, %10 : vector<8x128xf32>
    %14 = arith.subf %12, %13 : vector<8x128xf32>
    %15 = math.absf %0 : vector<8x128xf32>
    %cst_4 = arith.constant 0.000000e+00 : f32
    %16 = vector.broadcast %cst_4 : f32 to vector<8x128xf32>
    %17 = arith.subf %16, %15 : vector<8x128xf32>
    %18 = math.exp %17 : vector<8x128xf32>
    %19 = math.log1p %18 : vector<8x128xf32>
    %20 = arith.addf %14, %19 : vector<8x128xf32>
    %21 = tpu.iota {dimensions = array<i32: 0>} : vector<8x128xi32>
    %c128_i32 = arith.constant 128 : i32
    %22 = vector.broadcast %c128_i32 : i32 to vector<8x128xi32>
    %23 = arith.muli %21, %22 : vector<8x128xi32>
    %24 = arith.addi %23, %4 : vector<8x128xi32>
    %c0_5 = arith.constant 0 : index
    %25 = memref.load %arg0[%c0_5] : memref<1xi32, #tpu.memory_space<smem>>
    %c1_i32_6 = arith.constant 1 : i32
    %26 = vector.broadcast %c1_i32_6 : i32 to vector<8x128xi32>
    %27 = arith.cmpi sge, %24, %26 : vector<8x128xi32>
    %28 = vector.broadcast %25 : i32 to vector<8x128xi32>
    %29 = arith.cmpi slt, %24, %28 : vector<8x128xi32>
    %30 = arith.andi %27, %29 : vector<8x128xi1>
    %cst_7 = arith.constant 0.000000e+00 : f32
    %31 = vector.broadcast %cst_7 : f32 to vector<8x128xf32>
    %32 = arith.select %30, %20, %31 : vector<8x128xi1>, vector<8x128xf32>
    %33 = vector.shape_cast %32 : vector<8x128xf32> to vector<1x8x128xf32>
    %cst_8 = arith.constant dense<0.000000e+00> : vector<1xf32>
    %34 = vector.multi_reduction <add>, %33, %cst_8 [1, 2] : vector<1x8x128xf32> to vector<1xf32>
    %35 = vector.shape_cast %34 : vector<1xf32> to vector<1x1x1xf32>
    %36 = vector.extract %35[0, 0, 0] : f32 from vector<1x1x1xf32>
    %c1_i32_9 = arith.constant 1 : i32
    %37 = arith.subi %25, %c1_i32_9 : i32
    %38 = arith.sitofp %37 : i32 to f32
    %39 = arith.divf %36, %38 : f32
    %c0_10 = arith.constant 0 : index
    %c0_11 = arith.constant 0 : index
    %40 = memref.load %arg3[%c0_10, %c0_11] : memref<1x1xf32, #tpu.memory_space<smem>>
    memref.store %39, %arg3[%c0_10, %c0_11] : memref<1x1xf32, #tpu.memory_space<smem>>
    return
  }
}

</mosaic_0001>

<bundles_post_ra>
// kernel: tpu_custom_call.1
= control target key start
LH: loop header
LB: loop body
LE: loop exit
PB: predicated region body
PF: predicated region fallthrough
CT: control target
= control target key end

     0   :  { %9 = vsyncpa [#allocation4], 0  ;;  %s255_s0 = inlined_call_operand.<no memory space> [shape: s32[1], index: 0, kind: input, shape index: {}]   ;;  %s256_s1 = inlined_call_operand.hbm [shape: f32[8,128], index: 1, kind: input, shape index: {}]   ;;  %s257_s2 = inlined_call_operand.hbm [shape: s32[8,128], index: 2, kind: input, shape index: {}]   ;;  %s258_s3 = inlined_call_operand.hbm [shape: f32[1,1], index: 3, kind: output, shape index: {}]  }
   0x1   :  { %10 = vsyncpa [#allocation7], 0 }
   0x2   :  { %11 = vsyncpa [#allocation5], 0  ;;  %s188_s12 = smov [#allocation3]   ;;  %s189_s14 = smov [#allocation6]  }
   0x3   :  { %s20_s13 = sshll.u32 %s188_s12, 4  ;;  %s30_s15 = sshll.u32 %s189_s14, 4  ;;  %s21_s13 = int_to_ptr.vmem [resolvable:$true] %s20_s13  ;;  %s31_s15 = int_to_ptr.vmem [resolvable:$true] %s30_s15 }
   0x4   :  { %s128_s18 = scalar_lea.hbm %s256_s1, 128 }
   0x5   :  { %p129_p0 = scmp.ne.s32.totalorder %s256_s1, %s128_s18  ;;  %p132_p1 = scmp.lt.u32.totalorder %s128_s18, %s256_s1 }
   0x7   :  { %p134_p2 = pnand %p132_p1, %p129_p0 }
   0x9   :  { %137 = shalt.err (!%p134_p2)
}
   0xa   :  { %s138_s23 = scalar_lea.vmem %s21_s13, 128  ;;  %p143_p4 = scmp.lt.s32.totalorder %s21_s13, %s21_s13 }
   0xb   :  { %p139_p3 = scmp.ne.s32.totalorder %s21_s13, %s138_s23  ;;  %p144_p5 = scmp.lt.s32.totalorder %s138_s23, %s138_s23 }
   0xd   :  { %p145_p6 = por %p144_p5, %p143_p4 }
   0xf   :  { %p146_p7 = pnand %p145_p6, %p139_p3 }
  0x11   :  { %149 = shalt.err (!%p146_p7)
}
  0x12   :  { %23 = dma.hbm_to_vmem [thread:$0]  %s256_s1, 128, %s21_s13, [#allocation4]  }
  0x13   :  { %s150_s28 = scalar_lea.hbm %s257_s2, 128 }
  0x14   :  { %p151_p8 = scmp.ne.s32.totalorder %s257_s2, %s150_s28  ;;  %p154_p9 = scmp.lt.u32.totalorder %s150_s28, %s257_s2 }
  0x16   :  { %p156_p10 = pnand %p154_p9, %p151_p8 }
  0x18   :  { %159 = shalt.err (!%p156_p10)
}
  0x19   :  { %s160_s6 = scalar_lea.vmem %s31_s15, 128  ;;  %p165_p12 = scmp.lt.s32.totalorder %s31_s15, %s31_s15 }
  0x1a   :  { %p161_p11 = scmp.ne.s32.totalorder %s31_s15, %s160_s6  ;;  %p166_p13 = scmp.lt.s32.totalorder %s160_s6, %s160_s6 }
  0x1c   :  { %p167_p0 = por %p166_p13, %p165_p12 }
  0x1e   :  { %p168_p1 = pnand %p167_p0, %p161_p11 }
  0x20   :  { %171 = shalt.err (!%p168_p1)
}
  0x21   :  { %33 = dma.hbm_to_vmem [thread:$0]  %s257_s2, 128, %s31_s15, [#allocation7]  }
  0x22   :  { %182 = dma.done.wait [#allocation4], 128  }
  0x23   :  { %183 = vsyncadd [#allocation4], 4294967168 }
  0x24   :  { %184 = dma.done.wait [#allocation7], 128  }
  0x25   :  { %185 = vsyncadd [#allocation7], 4294967168  ;;  %v41_v0 = vld [vmem:[#allocation6] sm:$0xff]  ;;  %s190_s8 = smov 1   ;;  %v40_v1 = vld [vmem:[#allocation3] sm:$0xff]  ;;  %v45_v7 = vlaneseq  ;;  %v75_v21 = vstv %s255_s0  ;;  %v191_v23 = vmov 0.0  }
  0x26   :  { %42 = vrot.lane.b32.xlu0 %v41_v0, %s190_s8  ;;  %v55_v2 = vand.u32 2147483647, %v40_v1  ;;  %v52_v22 = vmax.f32 %v40_v1, 0.0  ;;  %s112_s12 = sadd.s32 4294967295, %s255_s0  ;;  %s172_s0 = scalar_lea.hbm %s258_s3, 16 }
  0x27   :  { %v70_v8 = vshrl.u32 %v45_v7, 7  ;;  %v46_v10 = vand.u32 127, %v45_v7  ;;  %s89_s13 = scvt.s32.f32 %s112_s12  ;;  %p173_p2 = scmp.ne.s32.totalorder %s258_s3, %s172_s0 }
  0x28   :  { %v56_v3 = vsub.f32 0.0, %v55_v2  ;;  %p176_p3 = scmp.lt.u32.totalorder %s172_s0, %s258_s3 }
  0x29   :  { %v71_v11 = vmul.u32 128, %v70_v8  ;;  %vm47_vm0 = vcmp.eq.s32.totalorder %v46_v10, 0  ;;  %v90_v30 = vstv %s89_s13 }
  0x2a   :  { %v57_v4 = vmul.f32 1.442695, %v56_v3  ;;  %p178_p4 = pnand %p176_p3, %p173_p2 }
  0x2b   :  { %v72_v17 = vadd.s32 %v71_v11, %v46_v10 }
  0x2c   :  { %122 = vpow2.f32 %v57_v4 }
  0x2d   :  { %vm74_vm3 = vcmp.ge.s32.totalorder %v72_v17, 1  ;;  %vm76_vm4 = vcmp.lt.s32.totalorder %v72_v17, %v75_v21 }
  0x2e   :  { %vm77_vm5 = vmand %vm74_vm3, %vm76_vm4 }
  0x36   :  { %v123_v5 = vpop.eup %122 }
  0x37   :  { %v59_v6 = vadd.f32 1.0, %v123_v5  ;;  %v62_v9 = vmul.f32 -0.5, %v123_v5  ;;  %v65_v15 = vand.u32 2147483647, %v123_v5 }
  0x39   :  { %124 = vlog2.f32 %v59_v6  ;;  %v63_v12 = vadd.f32 1.0, %v62_v9  ;;  %vm66_vm2 = vcmp.lt.f32.partialorder %v65_v15, 0.0004427343 }
  0x3a   :  { %126 = vrcp.f32 %v90_v30 }
  0x3b   :  { %v64_v20 = vmul.f32 %v123_v5, %v63_v12 }
  0x43   :  { %v125_v13 = vpop.eup %124 }
  0x44   :  { %v61_v19 = vmul.f32 0.6931472, %v125_v13  ;;  %v127_v37 = vpop.eup %126 }
  0x46   :  { %v67_v26 = vsel %vm66_vm2, %v64_v20, %v61_v19 }
  0x98   :  { %v43_v14 = vpop.permute.xlu0 %42 }
  0x99   :  { %v44_v16 = vrot.slane %v43_v14, 7 }
  0x9b   :  { %v48_v18 = vsel %vm47_vm0, %v44_v16, %v43_v14 }
  0x9c   :  { %vm49_vm1 = vcmp.ne.s32.totalorder %v41_v0, %v48_v18 }
  0x9d   :  { %v111_v24 = vsel %vm49_vm1, 1.0, %v191_v23 }
  0x9e   :  { %v53_v25 = vmul.f32 %v111_v24, %v40_v1 }
  0xa0   :  { %v54_v27 = vsub.f32 %v52_v22, %v53_v25 }
  0xa2   :  { %v68_v28 = vadd.f32 %v67_v26, %v54_v27 }
  0xa4   :  { %v78_v29 = vsel %vm77_vm5, %v68_v28, 0.0 }
  0xa5   :  { %79 = vadd.xlane.f32.xlu0 %v78_v29 }
 0x132   :  { %v80_v31 = vpop.xlane.xlu0 %79 }
 0x133   :  { %v81_v32 = vrot.slane %v80_v31, 4 }
 0x135   :  { %v82_v33 = vadd.f32 %v81_v32, %v80_v31 }
 0x137   :  { %v83_v34 = vrot.slane %v82_v33, 2 }
 0x139   :  { %v84_v35 = vadd.f32 %v83_v34, %v82_v33 }
 0x13b   :  { %v85_v36 = vrot.slane %v84_v35, 1 }
 0x13d   :  { %v86_v38 = vadd.f32 %v85_v36, %v84_v35 }
 0x13f   :  { %113 = vpush %v86_v38 }
 0x140   :  { %115 = vpush %v127_v37 }
 0x170   :  { %s114_s14 = spop %113 }
 0x171   :  { %s116_s15 = spop %115 }
 0x172   :  { %s93_s16 = smul.f32 %s116_s15, %s114_s14 }
 0x174   :  { %95 = sst [smem:[#allocation8]] %s93_s16 }
 0x175   :  { %181 = shalt.err (!%p178_p4)
}
 0x176   :  { %s192_s23 = smov [#allocation8]  }
 0x177   :  { %103 = dma.smem_to_hbm %s192_s23, 16, %s258_s3, [#allocation5]  }
 0x178   :  { %186 = dma.done.wait [#allocation5], 16  }
 0x179   :  { %187 = vsyncadd [#allocation5], 4294967280 }
 0x17a   :  { %107 = sfence }
 0x17b   :  { %108 = vsyncpa [#allocation4], 1 }
 0x17c   :  { %109 = vsyncpa [#allocation7], 1 }
 0x17d   :  { %110 = vsyncpa [#allocation5], 1 }

</bundles_post_ra>
